<compile_context>
chip_gen: v5e
topology: v5e:2x2
jax: 0.10.0
libtpu: 0.0.40
codegen_flags: <defaults>
</compile_context>

<pallas_src>
import functools

import jax
import jax.numpy as jnp
from jax import lax
from jax.experimental import pallas as pl
from jax.experimental.pallas import tpu as pltpu


def _pick_batch_block(n):
    """Batch elements per grid step.

    Amortizes the ~600-cycle per-step overhead while keeping >= 2 grid steps when
    N >= 2 so both TensorCores get work on v7x (v5e/v6e have a single TC and are
    indifferent to the split).
    """
    if n <= 2:
        return 1
    for nb in (8, 4, 2):
        if n % nb == 0 and n // nb >= 2:
            return nb
    return 1


def _dwsep_same_kernel(x_ref, w_ref, b_ref, m_ref, o_ref,
                       *, K, dilation, padding, H, W, Nb):
    """Fast path: stride==1 and 2*padding == dilation*(K-1)  (=> Ho==H, Wo==W).

    x_ref : (Nb, Cin, H*W)   lane-dense input block (flattened spatial on lanes)
    w_ref : (Cout, K*K*Cin)  fused (pointwise x depthwise) weight
    b_ref : (Cout, 1)        fused bias (f32)
    m_ref : (K*K, H*W)       {0,1} zero-padding masks per tap (input dtype)
    o_ref : (Nb, Cout, H*W)  lane-dense output block
    """
    HW = H * W
    mvals = m_ref[...]                      # (K*K, HW) -- hoisted out of all loops
    w = w_ref[...]
    b = b_ref[...]

    for n in range(Nb):                     # static unroll; Nb is small
        xn = x_ref[n]                       # (Cin, HW), lane-dense
        taps = []
        for kh in range(K):
            for kw in range(K):
                dh = kh * dilation - padding
                dw = kw * dilation - padding
                s = dh * W + dw             # flat lane shift for this tap
                # tap[p] = x[p + s]  ==  roll(x, -s); shift passed non-negative.
                t = xn if s == 0 else pltpu.roll(xn, (-s) % HW, axis=1)
                if dh != 0 or dw != 0:
                    # Zero the lanes whose source fell outside the image (exact
                    # zero padding for finite inputs); mask multiply rides the VPU.
                    idx = kh * K + kw
                    t = t * mvals[idx:idx + 1, :]
                taps.append(t)
        pmat = jnp.concatenate(taps, axis=0)                 # (K*K*Cin, HW)
        acc = jnp.dot(w, pmat, preferred_element_type=jnp.float32)
        acc = acc + b                                        # f32 bias add
        o_ref[n] = acc.astype(o_ref.dtype)                   # lane-dense store


def _dwsep_general_kernel(x_ref, w_ref, b_ref, o_ref, xp_ref,
                          *, K, stride, dilation, padding, H, W, Ho, Wo):
    """Fallback for stride>1 / non-'same' padding: slice-based im2col.

    TODO(synk): not lane-optimized (narrow slices + relayout); rewrite with
                stride-1 roll taps + a single downsample if these configs matter.
    """
    # --- zero padding inside the kernel (no HBM round-trip for a padded copy) ---
    if padding > 0:
        xp_ref[...] = jnp.zeros_like(xp_ref)
        xp_ref[:, padding:padding + H, padding:padding + W] = x_ref[0]
        xp = xp_ref[...]                                     # (Cin, Hp, Wp)
    else:
        xp = x_ref[0]                                        # (Cin, H, W)

    cols = []
    for kh in range(K):
        for kw in range(K):
            h0 = kh * dilation
            w0 = kw * dilation
            cols.append(xp[:, h0:h0 + (Ho - 1) * stride + 1:stride,
                              w0:w0 + (Wo - 1) * stride + 1:stride])  # (Cin, Ho, Wo)
    Cin = x_ref.shape[1]
    pmat = jnp.concatenate(cols, axis=0).reshape(K * K * Cin, Ho * Wo)

    acc = jnp.dot(w_ref[...], pmat, preferred_element_type=jnp.float32)
    acc = acc + b_ref[...]
    o_ref[0] = acc.astype(o_ref.dtype)


def depthwise_separable_conv(x_nchw, wdw, bdw, wpw, bpw,
                             *, stride=1, padding=0, dilation=1):
    """Matches torch DepthWiseSeparableConv.forward (padding_mode='zeros').

    x_nchw : (N, Cin, H, W)
    wdw    : (Cin, 1, K, K)     depthwise weight (torch Conv2d, groups=Cin)
    bdw    : (Cin,)             depthwise bias
    wpw    : (Cout, Cin, 1, 1)  pointwise weight
    bpw    : (Cout,)            pointwise bias
    returns: (N, Cout, Ho, Wo)
    """
    N, Cin, H, W = x_nchw.shape
    K = wdw.shape[2]
    Cout = wpw.shape[0]
    Hp, Wp = H + 2 * padding, W + 2 * padding
    Ho = (Hp - dilation * (K - 1) - 1) // stride + 1
    Wo = (Wp - dilation * (K - 1) - 1) // stride + 1

    # Fold depthwise taps into the pointwise weight (tiny, done once outside):
    #   w_eff[co, (kh*K + kw)*Cin + ci] = wpw[co,ci] * wdw[ci,kh,kw]
    #   b_eff = wpw @ bdw + bpw
    wdw_f = wdw[:, 0, :, :].astype(jnp.float32)              # (Cin, K, K)
    wpw_f = wpw[:, :, 0, 0].astype(jnp.float32)              # (Cout, Cin)
    w_eff = jnp.einsum('oc,chw->ohwc', wpw_f, wdw_f).reshape(Cout, K * K * Cin)
    w_eff = w_eff.astype(x_nchw.dtype)                       # MXU-native dtype
    b_eff = (wpw_f @ bdw.astype(jnp.float32)
             + bpw.astype(jnp.float32)).reshape(Cout, 1)     # bias stays f32

    itemsize = jnp.dtype(x_nchw.dtype).itemsize
    cost = pl.CostEstimate(
        flops=2 * N * Ho * Wo * Cout * K * K * Cin,
        transcendentals=0,
        bytes_accessed=(N * Cin * H * W * itemsize
                        + Cout * K * K * Cin * itemsize + Cout * 4
                        + N * Cout * Ho * Wo * itemsize),
    )

    same_spatial = (stride == 1 and 2 * padding == dilation * (K - 1))

    if same_spatial:
        # ---------------- fast path: roll + mask im2col, batch-blocked ----------
        Nb = _pick_batch_block(N)

        # {0,1} boundary masks per tap, computed once outside the kernel.
        rows = jnp.arange(H).reshape(H, 1)
        cols = jnp.arange(W).reshape(1, W)
        masks = []
        for kh in range(K):
            for kw in range(K):
                dh = kh * dilation - padding
                dw = kw * dilation - padding
                valid = ((rows + dh >= 0) & (rows + dh < H)
                         & (cols + dw >= 0) & (cols + dw < W))
                masks.append(valid.reshape(H * W))
        mask = jnp.stack(masks, axis=0).astype(x_nchw.dtype)  # (K*K, H*W)

        kernel = functools.partial(_dwsep_same_kernel, K=K, dilation=dilation,
                                   padding=padding, H=H, W=W, Nb=Nb)

        out_flat = pl.pallas_call(
            kernel,
            out_shape=jax.ShapeDtypeStruct((N, Cout, Ho * Wo), x_nchw.dtype),
            grid=(N // Nb,),
            in_specs=[
                pl.BlockSpec((Nb, Cin, H * W), lambda i: (i, 0, 0)),
                pl.BlockSpec((Cout, K * K * Cin), lambda i: (0, 0)),
                pl.BlockSpec((Cout, 1), lambda i: (0, 0)),
                pl.BlockSpec((K * K, H * W), lambda i: (0, 0)),
            ],
            out_specs=pl.BlockSpec((Nb, Cout, Ho * Wo), lambda i: (i, 0, 0)),
            compiler_params=pltpu.CompilerParams(
                dimension_semantics=("parallel",)),
            cost_estimate=cost,
        )(x_nchw.reshape(N, Cin, H * W), w_eff, b_eff, mask)
        # Trailing-axis reshape of contiguous data: layout-free.
        return out_flat.reshape(N, Cout, Ho, Wo)

    # -------------------- general fallback: slice-based im2col ------------------
    kernel = functools.partial(_dwsep_general_kernel, K=K, stride=stride,
                               dilation=dilation, padding=padding,
                               H=H, W=W, Ho=Ho, Wo=Wo)
    out_flat = pl.pallas_call(
        kernel,
        out_shape=jax.ShapeDtypeStruct((N, Cout, Ho * Wo), x_nchw.dtype),
        grid=(N,),
        in_specs=[
            pl.BlockSpec((1, Cin, H, W), lambda n: (n, 0, 0, 0)),
            pl.BlockSpec((Cout, K * K * Cin), lambda n: (0, 0)),
            pl.BlockSpec((Cout, 1), lambda n: (0, 0)),
        ],
        out_specs=pl.BlockSpec((1, Cout, Ho * Wo), lambda n: (n, 0, 0)),
        scratch_shapes=[pltpu.VMEM((Cin, Hp, Wp), x_nchw.dtype)],
        compiler_params=pltpu.CompilerParams(
            dimension_semantics=("parallel",)),
        cost_estimate=cost,
    )(x_nchw, w_eff, b_eff)
    return out_flat.reshape(N, Cout, Ho, Wo)


def _reference(x_nchw, wdw, bdw, wpw, bpw, *, stride, padding, dilation):
    """Pure-JAX reference (lax conv), NCHW, for correctness check."""
    Cin = x_nchw.shape[1]
    dw = lax.conv_general_dilated(
        x_nchw, wdw,
        window_strides=(stride, stride),
        padding=((padding, padding), (padding, padding)),
        rhs_dilation=(dilation, dilation),
        dimension_numbers=("NCHW", "OIHW", "NCHW"),
        feature_group_count=Cin,
    ) + bdw.reshape(1, -1, 1, 1)
    pw = lax.conv_general_dilated(
        dw, wpw,
        window_strides=(1, 1),
        padding="VALID",
        dimension_numbers=("NCHW", "OIHW", "NCHW"),
    ) + bpw.reshape(1, -1, 1, 1)
    return pw


if __name__ == "__main__":
    # Small deterministic config: in_channels=4, out_channels=8, kernel_size=3,
    # stride=1, padding=1 (zeros), dilation=1, bias=True.
    N, Cin, H, W = 2, 4, 16, 16
    Cout, K = 8, 3
    stride, padding, dilation = 1, 1, 1

    key = jax.random.PRNGKey(0)
    kx, k1, k2, k3, k4 = jax.random.split(key, 5)
    x = jax.random.normal(kx, (N, Cin, H, W), jnp.float32)
    wdw = 0.1 * jax.random.normal(k1, (Cin, 1, K, K), jnp.float32)
    bdw = 0.1 * jax.random.normal(k2, (Cin,), jnp.float32)
    wpw = 0.1 * jax.random.normal(k3, (Cout, Cin, 1, 1), jnp.float32)
    bpw = 0.1 * jax.random.normal(k4, (Cout,), jnp.float32)

    out = depthwise_separable_conv(x, wdw, bdw, wpw, bpw,
                                   stride=stride, padding=padding,
                                   dilation=dilation)
    out = jax.block_until_ready(out)

    ref = _reference(x, wdw, bdw, wpw, bpw,
                     stride=stride, padding=padding, dilation=dilation)
    assert out.shape == ref.shape, (out.shape, ref.shape)
    assert jnp.allclose(out, ref, atol=1e-4, rtol=1e-4), \
        float(jnp.max(jnp.abs(out - ref)))
    print("KERNEL_OK")
</pallas_src>

<mosaic_0001>
module attributes {stable_mosaic.version = 11 : i64} {
  func.func @_dwsep_same_kernel(%arg0: i32, %arg1: memref<1x4x256xf32, #tpu.memory_space<vmem>>, %arg2: memref<8x36xf32, #tpu.memory_space<vmem>>, %arg3: memref<8x1xf32, #tpu.memory_space<vmem>>, %arg4: memref<9x256xf32, #tpu.memory_space<vmem>>, %arg5: memref<1x8x256xf32, #tpu.memory_space<vmem>>) attributes {dimension_semantics = [#tpu.dimension_semantics<parallel>], iteration_bounds = array<i64: 2>, scalar_prefetch = 0 : i64, scratch_operands = 0 : i64, tpu.core_type = #tpu.core_type<tc>, window_params = [{transform_indices = @transform_0, window_bounds = array<i64: 1, 4, 256>}, {pipeline_mode = #tpu.pipeline_mode<synchronous>, transform_indices = @transform_1, window_bounds = array<i64: 8, 36>}, {pipeline_mode = #tpu.pipeline_mode<synchronous>, transform_indices = @transform_2, window_bounds = array<i64: 8, 1>}, {pipeline_mode = #tpu.pipeline_mode<synchronous>, transform_indices = @transform_3, window_bounds = array<i64: 9, 256>}, {transform_indices = @transform_4, window_bounds = array<i64: 1, 8, 256>}]} {
    %c0 = arith.constant 0 : index
    %c0_0 = arith.constant 0 : index
    %0 = vector.load %arg4[%c0, %c0_0] : memref<9x256xf32, #tpu.memory_space<vmem>>, vector<9x256xf32>
    %c0_1 = arith.constant 0 : index
    %c0_2 = arith.constant 0 : index
    %1 = vector.load %arg2[%c0_1, %c0_2] : memref<8x36xf32, #tpu.memory_space<vmem>>, vector<8x36xf32>
    %c0_3 = arith.constant 0 : index
    %c0_4 = arith.constant 0 : index
    %2 = vector.load %arg3[%c0_3, %c0_4] : memref<8x1xf32, #tpu.memory_space<vmem>>, vector<8x1xf32>
    %c0_5 = arith.constant 0 : index
    %c0_6 = arith.constant 0 : index
    %c0_7 = arith.constant 0 : index
    %3 = vector.load %arg1[%c0_5, %c0_6, %c0_7] : memref<1x4x256xf32, #tpu.memory_space<vmem>>, vector<1x4x256xf32>
    %4 = vector.shape_cast %3 : vector<1x4x256xf32> to vector<4x256xf32>
    %c17_i32 = arith.constant 17 : i32
    %5 = tpu.dynamic_rotate %4 by %c17_i32 dim 1 : vector<4x256xf32>, i32 -> vector<4x256xf32>
    %6 = vector.extract_strided_slice %0 {offsets = [0, 0], sizes = [1, 256], strides = [1, 1]} : vector<9x256xf32> to vector<1x256xf32>
    %7 = vector.broadcast %6 : vector<1x256xf32> to vector<4x256xf32>
    %8 = arith.mulf %5, %7 : vector<4x256xf32>
    %c16_i32 = arith.constant 16 : i32
    %9 = tpu.dynamic_rotate %4 by %c16_i32 dim 1 : vector<4x256xf32>, i32 -> vector<4x256xf32>
    %10 = vector.extract_strided_slice %0 {offsets = [1, 0], sizes = [1, 256], strides = [1, 1]} : vector<9x256xf32> to vector<1x256xf32>
    %11 = vector.broadcast %10 : vector<1x256xf32> to vector<4x256xf32>
    %12 = arith.mulf %9, %11 : vector<4x256xf32>
    %c15_i32 = arith.constant 15 : i32
    %13 = tpu.dynamic_rotate %4 by %c15_i32 dim 1 : vector<4x256xf32>, i32 -> vector<4x256xf32>
    %14 = vector.extract_strided_slice %0 {offsets = [2, 0], sizes = [1, 256], strides = [1, 1]} : vector<9x256xf32> to vector<1x256xf32>
    %15 = vector.broadcast %14 : vector<1x256xf32> to vector<4x256xf32>
    %16 = arith.mulf %13, %15 : vector<4x256xf32>
    %c1_i32 = arith.constant 1 : i32
    %17 = tpu.dynamic_rotate %4 by %c1_i32 dim 1 : vector<4x256xf32>, i32 -> vector<4x256xf32>
    %18 = vector.extract_strided_slice %0 {offsets = [3, 0], sizes = [1, 256], strides = [1, 1]} : vector<9x256xf32> to vector<1x256xf32>
    %19 = vector.broadcast %18 : vector<1x256xf32> to vector<4x256xf32>
    %20 = arith.mulf %17, %19 : vector<4x256xf32>
    %c255_i32 = arith.constant 255 : i32
    %21 = tpu.dynamic_rotate %4 by %c255_i32 dim 1 : vector<4x256xf32>, i32 -> vector<4x256xf32>
    %22 = vector.extract_strided_slice %0 {offsets = [5, 0], sizes = [1, 256], strides = [1, 1]} : vector<9x256xf32> to vector<1x256xf32>
    %23 = vector.broadcast %22 : vector<1x256xf32> to vector<4x256xf32>
    %24 = arith.mulf %21, %23 : vector<4x256xf32>
    %c241_i32 = arith.constant 241 : i32
    %25 = tpu.dynamic_rotate %4 by %c241_i32 dim 1 : vector<4x256xf32>, i32 -> vector<4x256xf32>
    %26 = vector.extract_strided_slice %0 {offsets = [6, 0], sizes = [1, 256], strides = [1, 1]} : vector<9x256xf32> to vector<1x256xf32>
    %27 = vector.broadcast %26 : vector<1x256xf32> to vector<4x256xf32>
    %28 = arith.mulf %25, %27 : vector<4x256xf32>
    %c240_i32 = arith.constant 240 : i32
    %29 = tpu.dynamic_rotate %4 by %c240_i32 dim 1 : vector<4x256xf32>, i32 -> vector<4x256xf32>
    %30 = vector.extract_strided_slice %0 {offsets = [7, 0], sizes = [1, 256], strides = [1, 1]} : vector<9x256xf32> to vector<1x256xf32>
    %31 = vector.broadcast %30 : vector<1x256xf32> to vector<4x256xf32>
    %32 = arith.mulf %29, %31 : vector<4x256xf32>
    %c239_i32 = arith.constant 239 : i32
    %33 = tpu.dynamic_rotate %4 by %c239_i32 dim 1 : vector<4x256xf32>, i32 -> vector<4x256xf32>
    %34 = vector.extract_strided_slice %0 {offsets = [8, 0], sizes = [1, 256], strides = [1, 1]} : vector<9x256xf32> to vector<1x256xf32>
    %35 = vector.broadcast %34 : vector<1x256xf32> to vector<4x256xf32>
    %36 = arith.mulf %33, %35 : vector<4x256xf32>
    %37 = tpu.concatenate %8, %12, %16, %20, %4, %24, %28, %32, %36 in 0 : vector<4x256xf32>, vector<4x256xf32>, vector<4x256xf32>, vector<4x256xf32>, vector<4x256xf32>, vector<4x256xf32>, vector<4x256xf32>, vector<4x256xf32>, vector<4x256xf32> -> vector<36x256xf32>
    %cst = arith.constant dense<0.000000e+00> : vector<8x256xf32>
    %38 = tpu.matmul %1, %37, %cst {dimension_numbers = #tpu.dot_dimension_numbers<[1], [0], [0], [1], [0, 0, 1, 1], [], []>} : vector<8x36xf32>, vector<36x256xf32>, vector<8x256xf32> -> vector<8x256xf32>
    %39 = vector.broadcast %2 : vector<8x1xf32> to vector<8x256xf32>
    %40 = arith.addf %38, %39 : vector<8x256xf32>
    %c0_8 = arith.constant 0 : index
    %c0_9 = arith.constant 0 : index
    %c0_10 = arith.constant 0 : index
    %41 = vector.load %arg5[%c0_8, %c0_9, %c0_10] : memref<1x8x256xf32, #tpu.memory_space<vmem>>, vector<1x8x256xf32>
    %42 = vector.shape_cast %41 : vector<1x8x256xf32> to vector<8x256xf32>
    %43 = vector.shape_cast %40 : vector<8x256xf32> to vector<1x8x256xf32>
    tpu.vector_store %arg5[%c0_8, %c0_9, %c0_10], %43 {strides = array<i32>} : memref<1x8x256xf32, #tpu.memory_space<vmem>>, vector<1x8x256xf32>,
    return
  }
  func.func @transform_0(%arg0: i32) -> (i32, i32, i32) {
    %c0_i32 = arith.constant 0 : i32
    %c0_i32_0 = arith.constant 0 : i32
    %c0_i32_1 = arith.constant 0 : i32
    return %arg0, %c0_i32, %c0_i32_0 : i32, i32, i32
  }
  func.func @transform_1(%arg0: i32) -> (i32, i32) {
    %c0_i32 = arith.constant 0 : i32
    %c0_i32_0 = arith.constant 0 : i32
    %c0_i32_1 = arith.constant 0 : i32
    return %c0_i32, %c0_i32_0 : i32, i32
  }
  func.func @transform_2(%arg0: i32) -> (i32, i32) {
    %c0_i32 = arith.constant 0 : i32
    %c0_i32_0 = arith.constant 0 : i32
    %c0_i32_1 = arith.constant 0 : i32
    return %c0_i32, %c0_i32_0 : i32, i32
  }
  func.func @transform_3(%arg0: i32) -> (i32, i32) {
    %c0_i32 = arith.constant 0 : i32
    %c0_i32_0 = arith.constant 0 : i32
    %c0_i32_1 = arith.constant 0 : i32
    return %c0_i32, %c0_i32_0 : i32, i32
  }
  func.func @transform_4(%arg0: i32) -> (i32, i32, i32) {
    %c0_i32 = arith.constant 0 : i32
    %c0_i32_0 = arith.constant 0 : i32
    %c0_i32_1 = arith.constant 0 : i32
    return %arg0, %c0_i32, %c0_i32_0 : i32, i32, i32
  }
}

</mosaic_0001>

<bundles_post_ra>
// kernel: tpu_custom_call.1
= control target key start
LH: loop header
LB: loop body
LE: loop exit
PB: predicated region body
PF: predicated region fallthrough
CT: control target
= control target key end

     0   :  { %9 = vsyncpa [#allocation3], 0  ;;  %s1033_s0 = inlined_call_operand.hbm [shape: f32[2,4,256], index: 0, kind: input, shape index: {}]   ;;  %s1034_s1 = inlined_call_operand.vmem [shape: f32[8,36], index: 1, kind: input, shape index: {}]   ;;  %s1035_s2 = inlined_call_operand.vmem [shape: f32[8,1], index: 2, kind: input, shape index: {}]   ;;  %s1036_s3 = inlined_call_operand.hbm [shape: f32[9,256], index: 3, kind: input, shape index: {}]   ;;  %s1037_s4 = inlined_call_operand.hbm [shape: f32[2,8,256], index: 4, kind: output, shape index: {}]  }
   0x1   :  { %11 = vsyncpa [#allocation3 + $0x1], 0 }
   0x2   :  { %12 = vsyncpa [#allocation6], 0 }
   0x3   :  { %13 = vsyncpa [#allocation4], 0 }
   0x4   :  { %15 = vsyncpa [#allocation4 + $0x1], 0  ;;  %s826_s15 = smov 0   ;;  %s828_s16 = smov 0  }
   0x5   :  { %s830_s17 = smov 0   ;;  %s832_s18 = smov 0  }
   0x6 LB: > { %s158_s21 = sshll.u32 %s1036_s3, 4  ;;  %s850_s22 = sadd.s32 4294967295, %s787_s18   ;;  %s787_s18 = sphi %s832_s18, %s1047_s18   ;;  %s783_s17 = sphi %s830_s17, %s1046_s17   ;;  %s779_s16 = sphi %s828_s16, %s1045_s16   ;;  %s775_s15 = sphi %s826_s15, %s1044_s15   ;;  %s159_s21 = int_to_ptr.hbm [resolvable:$true] %s158_s21 }
   0x7   : > { %p564_p0 = scmp.ge.s32.totalorder %s787_s18, 1  ;;  %p42_p1 = scmp.eq.s32.totalorder %s850_s22, 0 }
   0x8   : > { %p141_p2 = scmp.lt.s32.totalorder %s787_s18, 3  ;;  %s789_s24 = smov [#allocation5]  }
   0x9   : > { %s160_s25 = sshll.u32 %s789_s24, 4  ;;  %s790_s26 = smov 256   ;;  %s161_s25 = int_to_ptr.vmem [resolvable:$true] %s160_s25 }
   0xa   : > { %p855_p3 = pnand %p564_p0, %p141_p2  ;;  %s791_s27 = smov 16  }
   0xb   : > { %s563_s28 = sadd.s32 4294967294, %s787_s18   ;;  %s866_s29 = sadd.s32 1, %s787_s18  }
   0xc   : > { %p593_p4 = pneg %p855_p3  ;;  %s28_s30 = sadd.s32 1, %s783_s17 }
   0xd   : > { %s25_s5 = ssub.s32 %s787_s18, %s866_s29  ;;  %p35_p7 = scmp.ne.s32.totalorder %s783_s17, %s779_s16 }
   0xe   : > { %p594_p6 = pnand %p593_p4, %p42_p1  ;;  %p26_p8 = scmp.eq.s32.totalorder %s25_s5, 0 }
   0xf   : > { %p36_p9 = scmp.eq.s32.totalorder %s787_s18, 0  ;;  %p41_p10 = scmp.ne.s32.totalorder %s779_s16, %s775_s15 }
  0x10   : > { %596 = dma.hbm_to_vmem [thread:$0]  (!%p594_p6), %s159_s21, 512, %s161_s25, [#allocation6], %s790_s26, %s790_s26, %s791_s27  }
  0x11   : > { %p128_p11 = scmp.eq.s32.totalorder %s850_s22, 1  ;;  %p882_p12 = por %p42_p1, %p41_p10 }
  0x12   : > { %s878_s6 = scalar_select %p26_p8, %s783_s17, %s28_s30  }
  0x13   : > { %p886_p13 = por %p128_p11, %p35_p7  ;;  %p134_p0 = scmp.eq.s32.totalorder %s563_s28, 1 }
  0x14   : > { %p37_p2 = por %p36_p9, %p35_p7  ;;  %s174_s9 = sand.u32 1, %s783_s17  }
  0x15   : > { %p891_p4 = por %p134_p0, %p41_p10  ;;  %p606_p6 = scmp.lt.s32.totalorder %s787_s18, 2 }
  0x16   : > { %s567_s11 = sshll.u32 %s174_s9, 3  ;;  %s583_s12 = sshll.u32 %s787_s18, 3 }
  0x17   : > { %s183_s19 = scalar_lea.hbm %s1033_s0, %s583_s12  ;;  %s178_s21 = scalar_lea.vmem [#allocation2], %s567_s11 }
  0x18   : > { %s185_s20 = sshll.u32 %s183_s19, 4  ;;  %s187_s24 = sshll.u32 %s178_s21, 4  ;;  %s186_s20 = int_to_ptr.hbm [resolvable:$true] %s185_s20  ;;  %s188_s24 = int_to_ptr.vmem [resolvable:$true] %s187_s24 }
  0x19   : > { %p900_p8 = pnand %p606_p6, %p37_p2  ;;  %s175_s26 = scalar_lea.sflag [#allocation3], %s174_s9 }
  0x1a   : > { %s687_s27 = sshra.s32 %s186_s20, 4  ;;  %s694_s11 = scalar_lea.hbm %s1033_s0, 16  ;;  %s688_s27 = int_to_ptr.hbm [resolvable:$true] %s687_s27 }
  0x1b   : > { %s689_s28 = scalar_lea.hbm %s688_s27, 8  ;;  %p691_p9 = pneg %p900_p8 }
  0x1c   : > { %p690_p7 = scmp.ne.s32.totalorder %s688_s27, %s689_s28  ;;  %p695_p0 = scmp.lt.s32.totalorder %s688_s27, %s1033_s0 }
  0x1d   : > { %p696_p2 = scmp.lt.s32.totalorder %s694_s11, %s689_s28 }
  0x1e   : > { %p692_p10 = pnand %p691_p9, %p690_p7 }
  0x1f   : > { %p697_p6 = por %p696_p2, %p695_p0 }
  0x20   : > { %p693_p11 = pneg %p692_p10 }
  0x22   : > { %p698_p5 = pnand %p697_p6, %p693_p11 }
  0x24   : > { %701 = shalt.err (!%p698_p5)
}
  0x25   : > { %600 = dma.hbm_to_vmem [thread:$0]  (!%p900_p8), %s186_s20, 128, %s188_s24, %s175_s26  }
  0x26   : > { %196 = sbr.rel (%p855_p3) target bundleno = 381 (0x17d), region = 36  ;;  %s917_s9 = sand.u32 (!%p855_p3), 1, %s779_s16  }
  0x27   : > { %s571_s14 = sshll.u32 (!%p855_p3), %s917_s9, 3  ;;  %s199_s19 = scalar_lea.sflag (!%p855_p3), [#allocation3], %s917_s9 }
  0x28   : > { %s202_s21 = scalar_lea.vmem (!%p855_p3), [#allocation2], %s571_s14 }
  0x2b   : > { %762 = dma.done.wait (%p882_p12), %s199_s19, 128  }
  0x2c   : > { %764 = vsyncadd (%p882_p12), %s199_s19, 4294967168 }
  0x2d   : > { %766 = dma.done.wait (%p42_p1), [#allocation6], 512  }
  0x2e   : > { %768 = vsyncadd (%p42_p1), [#allocation6], 4294966784  ;;  %v239_v0 = vld [vmem:[%s202_s21] sm:$0xff]  ;;  %s792_s23 = smov 16   ;;  %s793_s7 = smov 15   ;;  %v250_v25 = vlaneseq  ;;  %v238_v27 = vld [vmem:[%s1035_s2] sm:$0xff] }
  0x2f   : > { %241 = vst [vmem:[#allocation1] ss:$2 sm:$0xff] %v239_v0  ;;  %s794_s20 = smov 1   ;;  %s795_s24 = smov 127   ;;  %v800_v28 = vmov 0   ;;  %v941_v30 = vld [vmem:[#allocation5] sm:$0xff] }
  0x30   : > { %s796_s25 = smov 113   ;;  %s797_s26 = smov 112   ;;  %653 = vset.pattern.permute.xlu1 %v800_v28  ;;  %654 = vset.pattern.permute.xlu0 %v800_v28  ;;  %v938_v29 = vand.u32 127, %v250_v25  ;;  %v944_v32 = vld [vmem:[#allocation5 + $0x8] sm:$0xff]  ;;  %v319_v33 = vperm.slane %v941_v30, 5  ;;  %v351_v37 = vperm.slane %v941_v30, 7 }
  0x31   : > { %s798_s27 = smov 17   ;;  %s799_s28 = smov 111   ;;  %v352_v38 = vperm.slane %v944_v32, 7  ;;  %v271_v41 = vperm.slane %v941_v30, 1  ;;  %v320_v42 = vperm.slane %v944_v32, 5  ;;  %v272_v43 = vperm.slane %v944_v32, 1 }
  0x32   : > { %vm316_vm0 = vcmp.lt.s32.totalorder %v938_v29, 127  ;;  %vm348_vm1 = vcmp.lt.s32.totalorder %v938_v29, 112  ;;  %v303_v44 = vperm.slane %v941_v30, 3  ;;  %vm300_vm2 = vcmp.lt.s32.totalorder %v938_v29, 1  ;;  %v655_v50 = vld [vmem:[#allocation5 + $0x10] ss:$0 sm:$0xff] }
  0x33   : > { %vm332_vm3 = vcmp.lt.s32.totalorder %v938_v29, 113  ;;  %v304_v49 = vperm.slane %v944_v32, 3  ;;  %vm364_vm4 = vcmp.lt.s32.totalorder %v938_v29, 111  ;;  %v656_v51 = vld [vmem:[#allocation5 + $0x18] ss:$0 sm:$0xff]  ;;  %vm268_vm5 = vcmp.lt.s32.totalorder %v938_v29, 16 }
  0x34   : > { %v335_v52 = vperm.slane %v941_v30, 6  ;;  %v336_v53 = vperm.slane %v944_v32, 6  ;;  %vm400_vm6 = vcmask 1043456   ;;  %vm252_vm7 = vcmp.lt.s32.totalorder %v938_v29, 17  ;;  %s573_s13 = sshll.u32 %s917_s9, 4  ;;  %s584_s14 = sshll.u32 %s850_s22, 4 }
  0x35   : > { %vm284_vm8 = vcmp.lt.s32.totalorder %v938_v29, 15  ;;  %vm414_vm9 = vcmask 293888   ;;  %s737_s30 = scalar_lea.hbm %s1037_s4, 32 }
  0x36   : > { %v242_v1 = vld.sshfl [vmem:[#allocation1] sm:$0xff pattern:$0x75316420]  ;;  %v243_v2 = vld.sshfl [vmem:[#allocation1 + $0x8] sm:$0xff pattern:$0x75316420] }
  0x37   : > { %259 = vst [vmem:[#allocation1] ss:$2 sm:$0xff] %v239_v0 }
  0x3e   : > { %v260_v3 = vld.sshfl [vmem:[#allocation1] sm:$0xff pattern:$0x75316420]  ;;  %v261_v4 = vld.sshfl [vmem:[#allocation1 + $0x8] sm:$0xff pattern:$0x75316420] }
  0x3f   : > { %275 = vst [vmem:[#allocation1] ss:$2 sm:$0xff] %v239_v0  ;;  %264 = vrot.lane.b32.xlu1 %v260_v3, %s792_s23  ;;  %266 = vrot.lane.b32.xlu2 %v261_v4, %s792_s23  ;;  %s478_s23 = scalar_lea.hbm %s1037_s4, %s584_s14 }
  0x46   : > { %v276_v5 = vld.sshfl [vmem:[#allocation1] sm:$0xff pattern:$0x75316420]  ;;  %v277_v6 = vld.sshfl [vmem:[#allocation1 + $0x8] sm:$0xff pattern:$0x75316420] }
  0x47   : > { %280 = vrot.lane.b32.xlu0 %v276_v5, %s793_s7  ;;  %291 = vst [vmem:[#allocation1] ss:$2 sm:$0xff] %v239_v0 }
  0x4e   : > { %v292_v7 = vld.sshfl [vmem:[#allocation1] sm:$0xff pattern:$0x75316420]  ;;  %v293_v8 = vld.sshfl [vmem:[#allocation1 + $0x8] sm:$0xff pattern:$0x75316420] }
  0x4f   : > { %298 = vrot.lane.b32.xlu0 %v293_v8, %s794_s20  ;;  %307 = vst [vmem:[#allocation1] ss:$2 sm:$0xff] %v239_v0  ;;  %296 = vrot.lane.b32.xlu2 %v292_v7, %s794_s20 }
  0x56   : > { %v308_v9 = vld.sshfl [vmem:[#allocation1] sm:$0xff pattern:$0x75316420]  ;;  %v309_v10 = vld.sshfl [vmem:[#allocation1 + $0x8] sm:$0xff pattern:$0x75316420] }
  0x57   : > { %323 = vst [vmem:[#allocation1] ss:$2 sm:$0xff] %v239_v0  ;;  %312 = vrot.lane.b32.xlu2 %v308_v9, %s795_s24 }
  0x5e   : > { %v324_v11 = vld.sshfl [vmem:[#allocation1] sm:$0xff pattern:$0x75316420]  ;;  %v325_v12 = vld.sshfl [vmem:[#allocation1 + $0x8] sm:$0xff pattern:$0x75316420] }
  0x5f   : > { %328 = vrot.lane.b32.xlu0 %v324_v11, %s796_s25  ;;  %330 = vrot.lane.b32.xlu1 %v325_v12, %s796_s25  ;;  %339 = vst [vmem:[#allocation1] ss:$2 sm:$0xff] %v239_v0  ;;  %s467_s25 = scalar_lea.sflag [#allocation4], %s917_s9 }
  0x60   : > { %314 = vrot.lane.b32.xlu2 %v309_v10, %s795_s24  ;;  %s482_s24 = sshll.u32 %s478_s23, 4  ;;  %s483_s24 = int_to_ptr.hbm [resolvable:$true] %s482_s24 }
  0x66   : > { %v340_v13 = vld.sshfl [vmem:[#allocation1] sm:$0xff pattern:$0x75316420]  ;;  %v341_v14 = vld.sshfl [vmem:[#allocation1 + $0x8] sm:$0xff pattern:$0x75316420] }
  0x67   : > { %344 = vrot.lane.b32.xlu0 %v340_v13, %s797_s26  ;;  %355 = vst [vmem:[#allocation1] ss:$2 sm:$0xff] %v239_v0 }
  0x68   : > { %246 = vrot.lane.b32.xlu2 %v242_v1, %s798_s27 }
  0x6e   : > { %v356_v15 = vld.sshfl [vmem:[#allocation1] sm:$0xff pattern:$0x75316420]  ;;  %v357_v16 = vld.sshfl [vmem:[#allocation1 + $0x8] sm:$0xff pattern:$0x75316420] }
  0x6f   : > { %346 = vrot.lane.b32.xlu0 %v341_v14, %s797_s26  ;;  %360 = vrot.lane.b32.xlu1 %v356_v15, %s799_s28  ;;  %383 = vst [vmem:[#allocation1] ss:$2 sm:$0xff] %v239_v0  ;;  %v255_v14 = vperm.slane %v941_v30, 0  ;;  %s731_s26 = sshra.s32 %s483_s24, 4  ;;  %s732_s26 = int_to_ptr.hbm [resolvable:$true] %s731_s26 }
  0x70   : > { %s733_s22 = scalar_lea.hbm %s732_s26, 16  ;;  %p738_p12 = scmp.lt.s32.totalorder %s732_s26, %s1037_s4 }
  0x71   : > { %p734_p1 = scmp.ne.s32.totalorder %s732_s26, %s733_s22  ;;  %p739_p8 = scmp.lt.s32.totalorder %s737_s30, %s733_s22 }
  0x73   : > { %p735_p3 = pnand %p734_p1, %p886_p13  ;;  %p740_p7 = por %p739_p8, %p738_p12 }
  0x75   : > { %p736_p5 = pneg %p735_p3 }
  0x76   : > { %v384_v11 = vld.sshfl [vmem:[#allocation1] sm:$0xff pattern:$0x75316420]  ;;  %v385_v12 = vld.sshfl [vmem:[#allocation1 + $0x8] sm:$0xff pattern:$0x75316420] }
  0x77   : > { %248 = vrot.lane.b32.xlu0 %v243_v2, %s798_s27  ;;  %362 = vrot.lane.b32.xlu1 %v357_v16, %s799_s28  ;;  %p741_p9 = pnand %p740_p7, %p736_p5 }
  0x7f   : > { %282 = vrot.lane.b32.xlu1 %v277_v6, %s793_s7  ;;  %s232_s7 = scalar_lea.vmem [#allocation7], %s573_s13 }
  0x80   : > { %s480_s20 = sshll.u32 %s232_s7, 4  ;;  %s481_s20 = int_to_ptr.vmem [resolvable:$true] %s480_s20 }
  0x87   : > { %411 = vperm.xlu1 %653, %v238_v27  }
  0x99   : > { %v933_v18 = vpop.permute.xlu2 %266 }
  0xa9   : > { %v297_v20 = vpop.permute.xlu2 %296 }
  0xb1   : > { %v265_v21 = vpop.permute.xlu1 %264  ;;  %v313_v23 = vpop.permute.xlu2 %312 }
  0xb2   : > { %v269_v6 = vsel %vm268_vm5, %v265_v21, %v933_v18  ;;  %v270_v7 = vsel %vm268_vm5, %v933_v18, %v265_v21  ;;  %v287_v18 = vperm.slane %v941_v30, 2 }
  0xb3   : > { %v273_v25 = vmul.f32 %v271_v41, %v270_v7 }
  0xb9   : > { %v931_v17 = vpop.permute.xlu0 %280 }
  0xba   : > { %v315_v31 = vpop.permute.xlu2 %314 }
  0xbb   : > { %v317_v36 = vsel %vm316_vm0, %v313_v23, %v315_v31  ;;  %v318_v45 = vsel %vm316_vm0, %v315_v31, %v313_v23 }
  0xbc   : > { %v321_v46 = vmul.f32 %v319_v33, %v317_v36  ;;  %v322_v54 = vmul.f32 %v320_v42, %v318_v45  ;;  %v373_v36 = vrot.slane %v273_v25, 4 }
  0xbe   : > { %v390_v58 = vrot.slane %v321_v46, 4  ;;  %v391_v5 = vrot.slane %v322_v54, 4 }
  0xc0   : > { %v405_v23 = vsel %vm400_vm6, %v384_v11, %v390_v58 }
  0xc1   : > { %v299_v19 = vpop.permute.xlu0 %298 }
  0xc2   : > { %v302_v55 = vsel %vm300_vm2, %v299_v19, %v297_v20  ;;  %v301_v0 = vsel %vm300_vm2, %v297_v20, %v299_v19  ;;  %v247_v9 = vpop.permute.xlu2 %246  ;;  %v256_v19 = vperm.slane %v944_v32, 0  ;;  %v288_v20 = vperm.slane %v944_v32, 2 }
  0xc3   : > { %v305_v8 = vmul.f32 %v303_v44, %v302_v55  ;;  %v306_v13 = vmul.f32 %v304_v49, %v301_v0 }
  0xc5   : > { %v379_v28 = vrot.slane %v305_v8, 4  ;;  %v380_v31 = vrot.slane %v306_v13, 4 }
  0xd1   : > { %v329_v22 = vpop.permute.xlu0 %328  ;;  %v331_v24 = vpop.permute.xlu1 %330 }
  0xd2   : > { %v333_v56 = vsel %vm332_vm3, %v329_v22, %v331_v24  ;;  %v334_v57 = vsel %vm332_vm3, %v331_v24, %v329_v22  ;;  %v406_v24 = vsel %vm400_vm6, %v385_v12, %v391_v5 }
  0xd3   : > { %v337_v3 = vmul.f32 %v335_v52, %v333_v56  ;;  %v338_v4 = vmul.f32 %v336_v53, %v334_v57 }
  0xd9   : > { %v345_v26 = vpop.permute.xlu0 %344 }
  0xe1   : > { %v347_v34 = vpop.permute.xlu0 %346  ;;  %v361_v35 = vpop.permute.xlu1 %360 }
  0xe2   : > { %v349_v39 = vsel %vm348_vm1, %v345_v26, %v347_v34  ;;  %v350_v40 = vsel %vm348_vm1, %v347_v34, %v345_v26  ;;  %v274_v26 = vmul.f32 %v272_v43, %v269_v6 }
  0xe3   : > { %v353_v47 = vmul.f32 %v351_v37, %v349_v39  ;;  %v354_v48 = vmul.f32 %v352_v38, %v350_v40  ;;  %v237_v40 = vld [vmem:[%s1034_s1] sm:$0xff] }
  0xe4   : > { %v374_v37 = vrot.slane %v274_v26, 4 }
  0xe5   : > { %v396_v60 = vrot.slane %v353_v47, 4  ;;  %v397_v61 = vrot.slane %v354_v48, 4 }
  0xe7   : > { %v407_v15 = vsel %vm400_vm6, %v337_v3, %v396_v60  ;;  %v408_v16 = vsel %vm400_vm6, %v338_v4, %v397_v61 }
  0xe9   : > { %v363_v59 = vpop.permute.xlu1 %362  ;;  %v249_v10 = vpop.permute.xlu0 %248 }
  0xea   : > { %v365_v62 = vsel %vm364_vm4, %v361_v35, %v363_v59  ;;  %v366_v63 = vsel %vm364_vm4, %v363_v59, %v361_v35  ;;  %v253_v21 = vsel %vm252_vm7, %v247_v9, %v249_v10  ;;  %v254_v22 = vsel %vm252_vm7, %v249_v10, %v247_v9 }
  0xeb   : > { %v369_v1 = vmul.f32 %v655_v50, %v365_v62  ;;  %v370_v2 = vmul.f32 %v656_v51, %v366_v63  ;;  %v257_v33 = vmul.f32 %v255_v14, %v254_v22  ;;  %v258_v34 = vmul.f32 %v256_v19, %v253_v21 }
  0xed   : > { %574 = vmatpush.msk.msra.mxu0 %vm400_vm6, %v369_v1  ;;  %576 = vmatpush.msk.msra.mxu1 %vm400_vm6, %v370_v2  ;;  %v402_v41 = vsel %vm400_vm6, %v258_v34, %v374_v37 }
  0xef   : > { %436 = vmatpush.msra.mxu0 %v407_v15  ;;  %456 = vmatpush.msra.mxu1 %v408_v16 }
  0xf1   : > { %v283_v27 = vpop.permute.xlu1 %282  ;;  %437 = vmatpush.msra.mxu0 %v405_v23  ;;  %457 = vmatpush.msra.mxu1 %v406_v24 }
  0xf2   : > { %v285_v30 = vsel %vm284_vm8, %v931_v17, %v283_v27  ;;  %v286_v32 = vsel %vm284_vm8, %v283_v27, %v931_v17  ;;  %v401_v17 = vsel %vm400_vm6, %v257_v33, %v373_v36 }
  0xf3   : > { %v289_v35 = vmul.f32 %v287_v18, %v286_v32  ;;  %v290_v29 = vmul.f32 %v288_v20, %v285_v30 }
  0xf5   : > { %v403_v38 = vsel %vm400_vm6, %v289_v35, %v379_v28  ;;  %v404_v39 = vsel %vm400_vm6, %v290_v29, %v380_v31 }
  0xf6   : > { %438 = vmatpush.msra.mxu0 %v403_v38  ;;  %458 = vmatpush.msra.mxu1 %v404_v39 }
  0xf8   : > { %439 = vmatpush.msra.mxu0 %v401_v17  ;;  %459 = vmatpush.msra.mxu1 %v402_v41 }
  0xf9   : > { %575 = vmatmul.msk.f32.vlgmr.msra.gmra.mxu0 %vm414_vm9, %v237_v40  ;;  %577 = vmatmul.msk.f32.vlgmr.msra.gmra.mxu1 %vm414_vm9, %v237_v40  ;;  %v412_v42 = vpop.permute.xlu1 %411 }
 0x176   : > { %v441_v43 = vpop.f32.mrf.mxu0  ;;  %v461_v44 = vpop.f32.mrf.mxu1 }
 0x177   : > { %v442_v45 = vadd.f32 %v441_v43, %v412_v42  ;;  %v462_v46 = vadd.f32 %v461_v44, %v412_v42 }
 0x179   : > { %464 = vst [vmem:[%s232_s7] sm:$0xff] %v442_v45 }
 0x17a   : > { %465 = vst [vmem:[%s232_s7 + $0x8] sm:$0xff] %v462_v46 }
 0x17b   : > { %744 = shalt.err (!%p741_p9)
}
 0x17c   : > { %591 = dma.vmem_to_hbm [thread:$0]  (%p886_p13), %s481_s20, 256, %s483_s24, %s467_s25  }
 0x17d PF: > { %s494_s9 = sand.u32 1, %s775_s15   ;;  %p1043_p10 = scmp.ge.s32.totalorder %s787_s18, 2 }
 0x17e   : > { %s495_s12 = scalar_lea.sflag [#allocation4], %s494_s9 }
 0x17f   : > { %p602_p11 = pnand %p1043_p10, %p891_p4 }
 0x181   : > { %p603_p0 = pneg %p602_p11 }
 0x183   : > { %770 = dma.done.wait (%p603_p0), %s495_s12, 256  }
 0x184   : > { %772 = vsyncadd (%p603_p0), %s495_s12, 4294967040  ;;  %p18_p2 = scmp.ge.s32.totalorder %s866_s29, 4   ;;  %s1044_s15 = smov %s779_s16 }
 0x185   : > { %s1045_s16 = smov %s783_s17  ;;  %s1046_s17 = smov %s878_s6 }
 0x186   : > { %s1047_s18 = smov %s866_s29  ;;  %20 = sbr.rel (!%p18_p2) target bundleno = 6 (0x6), region = 85 }
 0x18b   :  { %501 = vsyncpa [#allocation3], 1 }
 0x18c   :  { %503 = vsyncpa [#allocation3 + $0x1], 1 }
 0x18d   :  { %504 = vsyncpa [#allocation6], 1 }
 0x18e   :  { %505 = vsyncpa [#allocation4], 1 }
 0x18f   :  { %507 = vsyncpa [#allocation4 + $0x1], 1 }

</bundles_post_ra>
